<compile_context>
chip_gen: v7x
topology: tpu7x:2x2x1
jax: 0.10.0
libtpu: 0.0.40
codegen_flags: <defaults>
</compile_context>

<pallas_src>
import jax
import jax.numpy as jnp
from jax.experimental import pallas as pl
from jax.experimental.pallas import tpu as pltpu


def _round_up(n, m):
    return ((n + m - 1) // m) * m


# ----------------------------- Pallas kernel --------------------------------
def gaussian_mlp_kernel(x_ref, w_ref, b_ref, out_ref):
    """Whole MLP for one batch tile.

    x_ref   : (TB, LANE)        zero-padded input tile
    w_ref   : (L, LANE, LANE)   zero-padded weight slab per layer
                                (last layer = concatenated mean|std head)
    b_ref   : (8, LANE)         row l = zero-padded bias of layer l
    out_ref : (TB, LANE)        lane-dense output; cols [:out_dim+std_dim] valid
    """
    n_layers = w_ref.shape[0]
    h = x_ref[...]
    # hidden layers: Linear + ReLU (statically unrolled)
    for l in range(n_layers - 1):
        h = jnp.dot(h, w_ref[l], preferred_element_type=jnp.float32)
        h = jnp.maximum(h + b_ref[l:l + 1, :], 0.0)
    # fused (mean | std) head -> single lane-dense store
    out_ref[...] = (jnp.dot(h, w_ref[n_layers - 1],
                            preferred_element_type=jnp.float32)
                    + b_ref[n_layers - 1:n_layers, :])


# --------------------------- parameter packing -------------------------------
def pack_params(params):
    """params = (*hidden_layers, mean_head, std_head), each (w:(in,out), b:(1,out)).
    Returns (w_packed, b_packed, out_dim, std_dim) with the mean/std heads fused
    into the last packed layer and everything zero-padded to LANE lanes."""
    *hidden, (wm, bm), (ws, bs) = params
    out_dim, std_dim = wm.shape[1], ws.shape[1]
    w_head = jnp.concatenate([wm, ws], axis=1)
    b_head = jnp.concatenate([bm.reshape(1, -1), bs.reshape(1, -1)], axis=1)
    layers = list(hidden) + [(w_head, b_head)]

    dims = [layers[0][0].shape[0]] + [w.shape[1] for w, _ in layers]
    lane = _round_up(max(dims), 128)
    n_layers = len(layers)

    w_packed = jnp.zeros((n_layers, lane, lane), jnp.float32)
    b_packed = jnp.zeros((_round_up(max(n_layers, 8), 8), lane), jnp.float32)
    for l, (w, b) in enumerate(layers):
        fin, fout = w.shape
        w_packed = w_packed.at[l, :fin, :fout].set(w.astype(jnp.float32))
        b_packed = b_packed.at[l, :fout].set(b.reshape(-1).astype(jnp.float32))
    return w_packed, b_packed, out_dim, std_dim


# ------------------------------- wrapper -------------------------------------
def gaussian_mlp_forward(x, packed, *, max_tile=512):
    """Returns (mean, std) — the parameters of the Normal the PyTorch module
    wraps.  Raw affine std, exactly as the module passes to Normal(mean, std)."""
    w_packed, b_packed, out_dim, std_dim = packed
    lane = w_packed.shape[-1]

    B = x.shape[0]
    x2 = x.reshape(B, -1).astype(jnp.float32)        # == x.reshape(B, -1)
    in_dim = x2.shape[1]

    # batch tile: pad tiny batches to a full sublane (8); tile big batches.
    if B <= max_tile:
        tb = _round_up(max(B, 8), 8)
        b_pad = tb
    else:
        tb = max_tile
        b_pad = _round_up(B, tb)
    x_pad = jnp.zeros((b_pad, lane), jnp.float32).at[:B, :in_dim].set(x2)

    out = pl.pallas_call(
        gaussian_mlp_kernel,
        out_shape=jax.ShapeDtypeStruct((b_pad, lane), jnp.float32),
        grid=(b_pad // tb,),
        in_specs=[
            pl.BlockSpec((tb, lane), lambda i: (i, 0)),          # x tile (pipelined)
            pl.BlockSpec(w_packed.shape, lambda i: (0, 0, 0)),   # weights resident
            pl.BlockSpec(b_packed.shape, lambda i: (0, 0)),      # biases resident
        ],
        out_specs=pl.BlockSpec((tb, lane), lambda i: (i, 0)),    # lane-dense output
        compiler_params=pltpu.CompilerParams(
            dimension_semantics=("parallel",)),                  # v7x 2-TC sharding
    )(x_pad, w_packed, b_packed)

    mean = out[:B, :out_dim]
    std = out[:B, out_dim:out_dim + std_dim]
    return mean, std


# --------------------------- parameter construction --------------------------
def init_linear(key, fan_in, fan_out):
    """Mimics torch.nn.Linear's U(-1/sqrt(in), 1/sqrt(in)); weight stored (in, out)."""
    kw, kb = jax.random.split(key)
    bound = 1.0 / jnp.sqrt(jnp.float32(fan_in))
    w = jax.random.uniform(kw, (fan_in, fan_out), jnp.float32, -bound, bound)
    b = jax.random.uniform(kb, (1, fan_out), jnp.float32, -bound, bound)
    return w, b


def init_params(key, input_dim, output_dim, hidden_dims, scalar_noise=True):
    dims = [input_dim] + list(hidden_dims)
    keys = jax.random.split(key, len(hidden_dims) + 2)
    fcs = [init_linear(keys[i], dims[i], dims[i + 1]) for i in range(len(dims) - 1)]
    mean_head = init_linear(keys[-2], dims[-1], output_dim)
    std_dim = 1 if scalar_noise else output_dim
    std_head = init_linear(keys[-1], dims[-1], std_dim)
    return (*fcs, mean_head, std_head)


# Pure-JAX reference for correctness checks
def reference_forward(x, params):
    B = x.shape[0]
    h = x.reshape(B, -1).astype(jnp.float32)
    *hidden, (wm, bm), (ws, bs) = params
    for w, b in hidden:
        h = jnp.maximum(h @ w + b, 0.0)
    return h @ wm + bm, h @ ws + bs


# TODO(synk): torch.distributions.Normal has no Pallas equivalent; the kernel
# returns the (mean, std) parameters.  The module passes the raw (possibly
# non-positive) affine std straight to Normal — mirrored here verbatim.

if __name__ == "__main__":
    key = jax.random.PRNGKey(0)
    kx, kp = jax.random.split(key)

    # shapes consistent with the module: x (2,4,2,2) -> flattened (2,16),
    # hidden_dims=(32,32), output_dim=4, scalar_noise=True
    batch, input_dim, output_dim = 2, 16, 4
    hidden_dims = (32, 32)

    x = jax.random.normal(kx, (batch, 4, 2, 2), jnp.float32)
    params = init_params(kp, input_dim, output_dim, hidden_dims, scalar_noise=True)
    packed = pack_params(params)

    mean, std = gaussian_mlp_forward(x, packed)
    jax.block_until_ready((mean, std))

    ref_mean, ref_std = reference_forward(x, params)
    assert mean.shape == (batch, output_dim)
    assert std.shape == (batch, 1)
    assert jnp.allclose(mean, ref_mean, atol=1e-5, rtol=1e-5)
    assert jnp.allclose(std, ref_std, atol=1e-5, rtol=1e-5)

    # exercise the batch grid (>1 tile) and padding path
    xb = jax.random.normal(jax.random.PRNGKey(1), (600, 4, 2, 2), jnp.float32)
    mean_b, std_b = gaussian_mlp_forward(xb, packed)
    jax.block_until_ready((mean_b, std_b))
    ref_mb, ref_sb = reference_forward(xb, params)
    assert jnp.allclose(mean_b, ref_mb, atol=1e-4, rtol=1e-4)
    assert jnp.allclose(std_b, ref_sb, atol=1e-4, rtol=1e-4)

    print("KERNEL_OK")
</pallas_src>

<mosaic_0001>
module attributes {stable_mosaic.version = 11 : i64} {
  func.func @gaussian_mlp_kernel(%arg0: i32, %arg1: memref<8x128xf32, #tpu.memory_space<vmem>>, %arg2: memref<3x128x128xf32, #tpu.memory_space<vmem>>, %arg3: memref<8x128xf32, #tpu.memory_space<vmem>>, %arg4: memref<8x128xf32, #tpu.memory_space<vmem>>) attributes {dimension_semantics = [#tpu.dimension_semantics<parallel>], iteration_bounds = array<i64: 1>, scalar_prefetch = 0 : i64, scratch_operands = 0 : i64, tpu.core_type = #tpu.core_type<tc>, window_params = [{transform_indices = @transform_0, window_bounds = array<i64: 8, 128>}, {pipeline_mode = #tpu.pipeline_mode<synchronous>, transform_indices = @transform_1, window_bounds = array<i64: 3, 128, 128>}, {pipeline_mode = #tpu.pipeline_mode<synchronous>, transform_indices = @transform_2, window_bounds = array<i64: 8, 128>}, {transform_indices = @transform_3, window_bounds = array<i64: 8, 128>}]} {
    %c0 = arith.constant 0 : index
    %c0_0 = arith.constant 0 : index
    %0 = vector.load %arg1[%c0, %c0_0] : memref<8x128xf32, #tpu.memory_space<vmem>>, vector<8x128xf32>
    %c0_1 = arith.constant 0 : index
    %c0_2 = arith.constant 0 : index
    %c0_3 = arith.constant 0 : index
    %1 = vector.load %arg2[%c0_1, %c0_2, %c0_3] : memref<3x128x128xf32, #tpu.memory_space<vmem>>, vector<1x128x128xf32>
    %2 = vector.shape_cast %1 : vector<1x128x128xf32> to vector<128x128xf32>
    %cst = arith.constant dense<0.000000e+00> : vector<8x128xf32>
    %3 = tpu.matmul %0, %2, %cst {dimension_numbers = #tpu.dot_dimension_numbers<[1], [0], [0], [1], [0, 0, 1, 1], [], []>} : vector<8x128xf32>, vector<128x128xf32>, vector<8x128xf32> -> vector<8x128xf32>
    %c0_4 = arith.constant 0 : index
    %c0_5 = arith.constant 0 : index
    %4 = vector.load %arg3[%c0_4, %c0_5] : memref<8x128xf32, #tpu.memory_space<vmem>>, vector<1x128xf32>
    %5 = vector.broadcast %4 : vector<1x128xf32> to vector<8x128xf32>
    %6 = arith.addf %3, %5 : vector<8x128xf32>
    %cst_6 = arith.constant 0.000000e+00 : f32
    %7 = vector.broadcast %cst_6 : f32 to vector<8x128xf32>
    %8 = arith.maximumf %6, %7 : vector<8x128xf32>
    %c1 = arith.constant 1 : index
    %c0_7 = arith.constant 0 : index
    %c0_8 = arith.constant 0 : index
    %9 = vector.load %arg2[%c1, %c0_7, %c0_8] : memref<3x128x128xf32, #tpu.memory_space<vmem>>, vector<1x128x128xf32>
    %10 = vector.shape_cast %9 : vector<1x128x128xf32> to vector<128x128xf32>
    %cst_9 = arith.constant dense<0.000000e+00> : vector<8x128xf32>
    %11 = tpu.matmul %8, %10, %cst_9 {dimension_numbers = #tpu.dot_dimension_numbers<[1], [0], [0], [1], [0, 0, 1, 1], [], []>} : vector<8x128xf32>, vector<128x128xf32>, vector<8x128xf32> -> vector<8x128xf32>
    %c1_10 = arith.constant 1 : index
    %c0_11 = arith.constant 0 : index
    %12 = vector.load %arg3[%c1_10, %c0_11] : memref<8x128xf32, #tpu.memory_space<vmem>>, vector<1x128xf32>
    %13 = vector.broadcast %12 : vector<1x128xf32> to vector<8x128xf32>
    %14 = arith.addf %11, %13 : vector<8x128xf32>
    %cst_12 = arith.constant 0.000000e+00 : f32
    %15 = vector.broadcast %cst_12 : f32 to vector<8x128xf32>
    %16 = arith.maximumf %14, %15 : vector<8x128xf32>
    %c2 = arith.constant 2 : index
    %c0_13 = arith.constant 0 : index
    %c0_14 = arith.constant 0 : index
    %17 = vector.load %arg2[%c2, %c0_13, %c0_14] : memref<3x128x128xf32, #tpu.memory_space<vmem>>, vector<1x128x128xf32>
    %18 = vector.shape_cast %17 : vector<1x128x128xf32> to vector<128x128xf32>
    %cst_15 = arith.constant dense<0.000000e+00> : vector<8x128xf32>
    %19 = tpu.matmul %16, %18, %cst_15 {dimension_numbers = #tpu.dot_dimension_numbers<[1], [0], [0], [1], [0, 0, 1, 1], [], []>} : vector<8x128xf32>, vector<128x128xf32>, vector<8x128xf32> -> vector<8x128xf32>
    %c2_16 = arith.constant 2 : index
    %c0_17 = arith.constant 0 : index
    %20 = vector.load %arg3[%c2_16, %c0_17] : memref<8x128xf32, #tpu.memory_space<vmem>>, vector<1x128xf32>
    %21 = vector.broadcast %20 : vector<1x128xf32> to vector<8x128xf32>
    %22 = arith.addf %19, %21 : vector<8x128xf32>
    %c0_18 = arith.constant 0 : index
    %c0_19 = arith.constant 0 : index
    %23 = vector.load %arg4[%c0_18, %c0_19] : memref<8x128xf32, #tpu.memory_space<vmem>>, vector<8x128xf32>
    tpu.vector_store %arg4[%c0_18, %c0_19], %22 {strides = array<i32>} : memref<8x128xf32, #tpu.memory_space<vmem>>, vector<8x128xf32>,
    return
  }
  func.func @transform_0(%arg0: i32) -> (i32, i32) {
    %c0_i32 = arith.constant 0 : i32
    %c0_i32_0 = arith.constant 0 : i32
    return %arg0, %c0_i32 : i32, i32
  }
  func.func @transform_1(%arg0: i32) -> (i32, i32, i32) {
    %c0_i32 = arith.constant 0 : i32
    %c0_i32_0 = arith.constant 0 : i32
    %c0_i32_1 = arith.constant 0 : i32
    %c0_i32_2 = arith.constant 0 : i32
    return %c0_i32, %c0_i32_0, %c0_i32_1 : i32, i32, i32
  }
  func.func @transform_2(%arg0: i32) -> (i32, i32) {
    %c0_i32 = arith.constant 0 : i32
    %c0_i32_0 = arith.constant 0 : i32
    %c0_i32_1 = arith.constant 0 : i32
    return %c0_i32, %c0_i32_0 : i32, i32
  }
  func.func @transform_3(%arg0: i32) -> (i32, i32) {
    %c0_i32 = arith.constant 0 : i32
    %c0_i32_0 = arith.constant 0 : i32
    return %arg0, %c0_i32 : i32, i32
  }
}

</mosaic_0001>

<bundles_post_ra>
// kernel: tpu_custom_call.1
= control target key start
LH: loop header
LB: loop body
LE: loop exit
PB: predicated region body
PF: predicated region fallthrough
CT: control target
= control target key end

     0   :  { %8 = vsyncpa [#allocation3], 0  ;;  %s788_s0 = inlined_call_operand.hbm [shape: f32[8,128], index: 0, kind: input, shape index: {}]   ;;  %s789_s1 = inlined_call_operand.hbm [shape: f32[3,128,128], index: 1, kind: input, shape index: {}]   ;;  %s790_s2 = inlined_call_operand.hbm [shape: f32[8,128], index: 2, kind: input, shape index: {}]   ;;  %s791_s3 = inlined_call_operand.hbm [shape: f32[8,128], index: 3, kind: output, shape index: {}]  }
   0x1   :  { %9 = vsyncpa [#allocation6], 0 }
   0x2   :  { %10 = vsyncpa [#allocation4], 0  ;;  %s681_s12 = smov [#allocation5]   ;;  %s587_s16 = scalar_lea.hbm %s789_s1, 6144 }
   0x3   :  { %s26_s13 = sshll.u32 %s681_s12, 4  ;;  %p588_p0 = scmp.ne.s32.totalorder %s789_s1, %s587_s16  ;;  %s27_s13 = int_to_ptr.vmem [resolvable:$true] %s26_s13 }
   0x4   :  { %p591_p1 = scmp.lt.u32.totalorder %s587_s16, %s789_s1 }
   0x6   :  { %p593_p2 = pnand %p591_p1, %p588_p0 }
   0x8   :  { %596 = shalt.err (!%p593_p2)
}
   0x9   :  { %s597_s21 = scalar_lea.vmem %s27_s13, 6144  ;;  %p602_p4 = scmp.lt.s32.totalorder %s27_s13, %s27_s13 }
   0xa   :  { %p598_p3 = scmp.ne.s32.totalorder %s27_s13, %s597_s21  ;;  %p603_p5 = scmp.lt.s32.totalorder %s597_s21, %s597_s21 }
   0xc   :  { %p604_p6 = por %p603_p5, %p602_p4 }
   0xe   :  { %p605_p7 = pnand %p604_p6, %p598_p3 }
  0x10   :  { %608 = shalt.err (!%p605_p7)
}
  0x11   :  { %s682_s22 = smov 128   ;;  %s683_s23 = smov 8  }
  0x12   :  { %32 = dma.hbm_to_vmem [thread:$0]  %s789_s1, 6144, %s27_s13, [#allocation6], %s682_s22, %s682_s22, %s683_s23  }
  0x13   :  { %s684_s26 = smov [#allocation2]   ;;  %s685_s28 = smov [#allocation7]  }
  0x14   :  { %s17_s27 = sshll.u32 %s684_s26, 4  ;;  %s39_s29 = sshll.u32 %s685_s28, 4  ;;  %s18_s27 = int_to_ptr.vmem [resolvable:$true] %s17_s27  ;;  %s40_s29 = int_to_ptr.vmem [resolvable:$true] %s39_s29 }
  0x15   :  { %s609_s5 = scalar_lea.hbm %s788_s0, 128 }
  0x16   :  { %p610_p8 = scmp.ne.s32.totalorder %s788_s0, %s609_s5  ;;  %p613_p9 = scmp.lt.u32.totalorder %s609_s5, %s788_s0 }
  0x18   :  { %p615_p10 = pnand %p613_p9, %p610_p8 }
  0x1a   :  { %618 = shalt.err (!%p615_p10)
}
  0x1b   :  { %s619_s1 = scalar_lea.vmem %s18_s27, 128  ;;  %p624_p12 = scmp.lt.s32.totalorder %s18_s27, %s18_s27 }
  0x1c   :  { %p620_p11 = scmp.ne.s32.totalorder %s18_s27, %s619_s1  ;;  %p625_p13 = scmp.lt.s32.totalorder %s619_s1, %s619_s1 }
  0x1e   :  { %p626_p0 = por %p625_p13, %p624_p12 }
  0x20   :  { %p627_p1 = pnand %p626_p0, %p620_p11 }
  0x22   :  { %630 = shalt.err (!%p627_p1)
}
  0x23   :  { %20 = dma.hbm_to_vmem [thread:$0]  %s788_s0, 128, %s18_s27, [#allocation3]  }
  0x24   :  { %s631_s14 = scalar_lea.hbm %s790_s2, 128 }
  0x25   :  { %p632_p2 = scmp.ne.s32.totalorder %s790_s2, %s631_s14  ;;  %p635_p3 = scmp.lt.u32.totalorder %s631_s14, %s790_s2 }
  0x27   :  { %p637_p4 = pnand %p635_p3, %p632_p2 }
  0x29   :  { %640 = shalt.err (!%p637_p4)
}
  0x2a   :  { %s641_s19 = scalar_lea.vmem %s40_s29, 128  ;;  %p646_p6 = scmp.lt.s32.totalorder %s40_s29, %s40_s29 }
  0x2b   :  { %p642_p5 = scmp.ne.s32.totalorder %s40_s29, %s641_s19  ;;  %p647_p7 = scmp.lt.s32.totalorder %s641_s19, %s641_s19 }
  0x2d   :  { %p648_p8 = por %p647_p7, %p646_p6 }
  0x2f   :  { %p649_p9 = pnand %p648_p8, %p642_p5 }
  0x31   :  { %652 = shalt.err (!%p649_p9)
}
  0x32   :  { %42 = dma.hbm_to_vmem [thread:$0]  %s790_s2, 128, %s40_s29, [#allocation6]  }
  0x33   :  { %675 = dma.done.wait [#allocation3], 128  }
  0x34   :  { %676 = vsyncadd [#allocation3], 4294967168 }
  0x35   :  { %677 = dma.done.wait [#allocation6], 6272  }
  0x36   :  { %678 = vsyncadd [#allocation6], 4294961024  ;;  %v686_v0 = vmov 0.0|0.0   ;;  %vm687_vm0 = vmmov 0   ;;  %v688_v1 = vmov 0.0   ;;  %v53_v2 = vld [vmem:[#allocation5] sm:$0xff] }
  0x37   :  { %506 = vmatprep.subr.bf16.mxu0 %v686_v0  ;;  %433 = vmatprep.mubr.msk.f32.mxu0 %vm687_vm0, %v688_v1  ;;  %v54_v3 = vld [vmem:[#allocation5 + $0x8] sm:$0xff]  ;;  %v55_v4 = vld [vmem:[#allocation5 + $0x10] sm:$0xff]  ;;  %v56_v6 = vld [vmem:[#allocation5 + $0x18] sm:$0xff]  ;;  %s689_s2 = smov [#allocation8]  }
  0x38   :  { %530 = vmatprep.subr.bf16.mxu1 %v686_v0  ;;  %468 = vmatprep.mubr.msk.f32.mxu1 %vm687_vm0, %v688_v1  ;;  %v507_v5 = vpack.c.bf16 %v54_v3, %v53_v2  ;;  %v510_v7 = vpack.c.bf16 %v56_v6, %v55_v4  ;;  %v57_v8 = vld [vmem:[#allocation5 + $0x20] sm:$0xff]  ;;  %v58_v9 = vld [vmem:[#allocation5 + $0x28] sm:$0xff]  ;;  %v148_v12 = vld [vmem:[#allocation5 + $0x90] sm:$0xff]  ;;  %s337_s21 = sshll.u32 %s689_s2, 4  ;;  %s338_s21 = int_to_ptr.vmem [resolvable:$true] %s337_s21 }
  0x39   :  { %v146_v10 = vld [vmem:[#allocation5 + $0x80] sm:$0xff]  ;;  %v147_v11 = vld [vmem:[#allocation5 + $0x88] sm:$0xff]  ;;  %v149_v13 = vld [vmem:[#allocation5 + $0x98] sm:$0xff]  ;;  %v513_v14 = vpack.c.bf16 %v58_v9, %v57_v8  ;;  %s653_s22 = scalar_lea.vmem %s338_s21, 128  ;;  %p658_p11 = scmp.lt.s32.totalorder %s338_s21, %s338_s21 }
  0x3a   :  { %508 = vmatpush3.bf16.msra.mxu0 %v507_v5  ;;  %v531_v15 = vpack.c.bf16 %v147_v11, %v146_v10  ;;  %v59_v16 = vld [vmem:[#allocation5 + $0x30] sm:$0xff]  ;;  %v60_v17 = vld [vmem:[#allocation5 + $0x38] sm:$0xff]  ;;  %v534_v18 = vpack.c.bf16 %v149_v13, %v148_v12  ;;  %v150_v19 = vld [vmem:[#allocation5 + $0xa0] sm:$0xff]  ;;  %p654_p10 = scmp.ne.s32.totalorder %s338_s21, %s653_s22  ;;  %p659_p12 = scmp.lt.s32.totalorder %s653_s22, %s653_s22 }
  0x3b   :  { %509 = vmatprep.subr.bf16.mxu0 %v686_v0  ;;  %v151_v20 = vld [vmem:[#allocation5 + $0xa8] sm:$0xff]  ;;  %v516_v21 = vpack.c.bf16 %v60_v17, %v59_v16  ;;  %v61_v22 = vld [vmem:[#allocation5 + $0x40] sm:$0xff]  ;;  %v152_v25 = vld [vmem:[#allocation5 + $0xb0] sm:$0xff] }
  0x3c   :  { %532 = vmatpush3.bf16.msra.mxu1 %v531_v15  ;;  %v62_v23 = vld [vmem:[#allocation5 + $0x48] sm:$0xff]  ;;  %v537_v24 = vpack.c.bf16 %v151_v20, %v150_v19  ;;  %v153_v26 = vld [vmem:[#allocation5 + $0xb8] sm:$0xff]  ;;  %v63_v28 = vld [vmem:[#allocation5 + $0x50] sm:$0xff]  ;;  %p660_p13 = por %p659_p12, %p658_p11 }
  0x3d   :  { %533 = vmatprep.subr.bf16.mxu1 %v686_v0  ;;  %v519_v27 = vpack.c.bf16 %v62_v23, %v61_v22  ;;  %v64_v29 = vld [vmem:[#allocation5 + $0x58] sm:$0xff]  ;;  %v540_v30 = vpack.c.bf16 %v153_v26, %v152_v25  ;;  %v154_v31 = vld [vmem:[#allocation5 + $0xc0] sm:$0xff]  ;;  %v155_v32 = vld [vmem:[#allocation5 + $0xc8] sm:$0xff] }
  0x3e   :  { %511 = vmatpush3.bf16.msra.mxu0 %v510_v7  ;;  %v522_v33 = vpack.c.bf16 %v64_v29, %v63_v28  ;;  %v65_v34 = vld [vmem:[#allocation5 + $0x60] sm:$0xff]  ;;  %v66_v35 = vld [vmem:[#allocation5 + $0x68] sm:$0xff]  ;;  %v543_v36 = vpack.c.bf16 %v155_v32, %v154_v31  ;;  %v156_v37 = vld [vmem:[#allocation5 + $0xd0] sm:$0xff]  ;;  %p661_p0 = pnand %p660_p13, %p654_p10 }
  0x3f   :  { %512 = vmatprep.subr.bf16.mxu0 %v686_v0  ;;  %v157_v38 = vld [vmem:[#allocation5 + $0xd8] sm:$0xff]  ;;  %v525_v39 = vpack.c.bf16 %v66_v35, %v65_v34  ;;  %v67_v40 = vld [vmem:[#allocation5 + $0x70] sm:$0xff]  ;;  %v158_v43 = vld [vmem:[#allocation5 + $0xe0] sm:$0xff] }
  0x40   :  { %535 = vmatpush3.bf16.msra.mxu1 %v534_v18  ;;  %v68_v41 = vld [vmem:[#allocation5 + $0x78] sm:$0xff]  ;;  %v546_v42 = vpack.c.bf16 %v157_v38, %v156_v37  ;;  %v159_v44 = vld [vmem:[#allocation5 + $0xe8] sm:$0xff]  ;;  %v160_v48 = vld [vmem:[#allocation5 + $0xf0] sm:$0xff] }
  0x41   :  { %536 = vmatprep.subr.bf16.mxu1 %v686_v0  ;;  %v528_v45 = vpack.c.bf16 %v68_v41, %v67_v40  ;;  %v549_v46 = vpack.c.bf16 %v159_v44, %v158_v43  ;;  %v52_v47 = vld [vmem:[#allocation2] sm:$0xff]  ;;  %v239_v51 = vld [vmem:[#allocation5 + $0x100] sm:$0xff]  ;;  %v240_v52 = vld [vmem:[#allocation5 + $0x108] sm:$0xff] }
  0x42   :  { %514 = vmatpush3.bf16.msra.mxu0 %v513_v14  ;;  %v161_v49 = vld [vmem:[#allocation5 + $0xf8] sm:$0xff]  ;;  %v241_v53 = vld [vmem:[#allocation5 + $0x110] sm:$0xff]  ;;  %v555_v54 = vpack.c.bf16 %v240_v52, %v239_v51  ;;  %v243_v57 = vld [vmem:[#allocation5 + $0x120] sm:$0xff] }
  0x43   :  { %515 = vmatprep.subr.bf16.mxu0 %v686_v0  ;;  %v552_v50 = vpack.c.bf16 %v161_v49, %v160_v48  ;;  %v242_v55 = vld [vmem:[#allocation5 + $0x118] sm:$0xff]  ;;  %v244_v58 = vld [vmem:[#allocation5 + $0x128] sm:$0xff]  ;;  %v245_v60 = vld [vmem:[#allocation5 + $0x130] sm:$0xff] }
  0x44   :  { %538 = vmatpush3.bf16.msra.mxu1 %v537_v24  ;;  %v558_v56 = vpack.c.bf16 %v242_v55, %v241_v53  ;;  %v561_v59 = vpack.c.bf16 %v244_v58, %v243_v57  ;;  %v246_v61 = vld [vmem:[#allocation5 + $0x138] sm:$0xff]  ;;  %v247_v63 = vld [vmem:[#allocation5 + $0x140] sm:$0xff]  ;;  %v249_v3 = vld [vmem:[#allocation5 + $0x150] sm:$0xff] }
  0x45   :  { %539 = vmatprep.subr.bf16.mxu1 %v686_v0  ;;  %v564_v62 = vpack.c.bf16 %v246_v61, %v245_v60  ;;  %v250_v4 = vld [vmem:[#allocation5 + $0x158] sm:$0xff]  ;;  %v251_v6 = vld [vmem:[#allocation5 + $0x160] sm:$0xff]  ;;  %v252_v7 = vld [vmem:[#allocation5 + $0x168] sm:$0xff] }
  0x46   :  { %517 = vmatpush3.bf16.msra.mxu0 %v516_v21  ;;  %v570_v5 = vpack.c.bf16 %v250_v4, %v249_v3  ;;  %v573_v8 = vpack.c.bf16 %v252_v7, %v251_v6  ;;  %v347_v9 = vld [vmem:[#allocation7] ss:$0 sm:$0xff]  ;;  %v253_v14 = vld [vmem:[#allocation5 + $0x170] sm:$0xff]  ;;  %v254_v15 = vld [vmem:[#allocation5 + $0x178] sm:$0xff] }
  0x47   :  { %518 = vmatprep.subr.bf16.mxu0 %v686_v0  ;;  %v576_v16 = vpack.c.bf16 %v254_v15, %v253_v14  ;;  %v348_v17 = vld [vmem:[#allocation7 + $0x1] ss:$0 sm:$0xff]  ;;  %v349_v22 = vld [vmem:[#allocation7 + $0x2] ss:$0 sm:$0xff] }
  0x48   :  { %541 = vmatpush3.bf16.msra.mxu1 %v540_v30 }
  0x49   :  { %542 = vmatprep.subr.bf16.mxu1 %v686_v0 }
  0x4a   :  { %520 = vmatpush3.bf16.msra.mxu0 %v519_v27 }
  0x4b   :  { %521 = vmatprep.subr.bf16.mxu0 %v686_v0 }
  0x4c   :  { %544 = vmatpush3.bf16.msra.mxu1 %v543_v36 }
  0x4d   :  { %545 = vmatprep.subr.bf16.mxu1 %v686_v0 }
  0x4e   :  { %523 = vmatpush3.bf16.msra.mxu0 %v522_v33 }
  0x4f   :  { %524 = vmatprep.subr.bf16.mxu0 %v686_v0 }
  0x50   :  { %547 = vmatpush3.bf16.msra.mxu1 %v546_v42 }
  0x51   :  { %548 = vmatprep.subr.bf16.mxu1 %v686_v0 }
  0x52   :  { %526 = vmatpush3.bf16.msra.mxu0 %v525_v39 }
  0x53   :  { %527 = vmatprep.subr.bf16.mxu0 %v686_v0 }
  0x54   :  { %550 = vmatpush3.bf16.msra.mxu1 %v549_v46 }
  0x55   :  { %551 = vmatprep.subr.bf16.mxu1 %v686_v0 }
  0x56   :  { %529 = vmatpush3.bf16.msra.mxu0 %v528_v45 }
  0x57   :  { %554 = vmatprep.subr.bf16.mxu0 %v686_v0 }
  0x58   :  { %553 = vmatpush3.bf16.msra.mxu1 %v552_v50 }
  0x59   :  { %434 = vmatmul.mubr.f32.vlgmr.msra.gmra.mrb[0].mxu0 %v52_v47 }
  0x5a   :  { %503 = vmatprep.mubr.msk.f32.mxu0 %vm687_vm0, %v688_v1  ;;  %556 = vmatpush3.bf16.msra.mxu0 %v555_v54  ;;  %v248_v1 = vld [vmem:[#allocation5 + $0x148] sm:$0xff] }
  0x5b   :  { %557 = vmatprep.subr.bf16.mxu0 %v686_v0  ;;  %v567_v2 = vpack.c.bf16 %v248_v1, %v247_v63 }
  0x5e   :  { %559 = vmatpush3.bf16.msra.mxu0 %v558_v56 }
  0x5f   :  { %560 = vmatprep.subr.bf16.mxu0 %v686_v0 }
  0x62   :  { %562 = vmatpush3.bf16.msra.mxu0 %v561_v59 }
  0x63   :  { %563 = vmatprep.subr.bf16.mxu0 %v686_v0 }
  0x66   :  { %565 = vmatpush3.bf16.msra.mxu0 %v564_v62 }
  0x67   :  { %566 = vmatprep.subr.bf16.mxu0 %v686_v0 }
  0x6a   :  { %568 = vmatpush3.bf16.msra.mxu0 %v567_v2 }
  0x6b   :  { %569 = vmatprep.subr.bf16.mxu0 %v686_v0 }
  0x6e   :  { %571 = vmatpush3.bf16.msra.mxu0 %v570_v5 }
  0x6f   :  { %572 = vmatprep.subr.bf16.mxu0 %v686_v0 }
  0x72   :  { %574 = vmatpush3.bf16.msra.mxu0 %v573_v8 }
  0x73   :  { %575 = vmatprep.subr.bf16.mxu0 %v686_v0 }
  0x76   :  { %577 = vmatpush3.bf16.msra.mxu0 %v576_v16 }
 0x12c   :  { %v140_v10 = vpop.f32.mrb[0].mxu0 }
 0x12d   :  { %v141_v11 = vadd.f32 %v347_v9, %v140_v10  ;;  %v435_v12 = vpop.f32.mrb[1].mxu0 }
 0x12f   :  { %v144_v13 = vmax.f32 %v141_v11, 0.0 }
 0x131   :  { %469 = vmatmul.mubr.f32.vlgmr.msra.gmra.mrb[0].mxu1 %v144_v13 }
 0x204   :  { %v233_v18 = vpop.f32.mrb[0].mxu1 }
 0x205   :  { %v234_v19 = vadd.f32 %v348_v17, %v233_v18  ;;  %v470_v20 = vpop.f32.mrb[1].mxu1 }
 0x207   :  { %v237_v21 = vmax.f32 %v234_v19, 0.0 }
 0x209   :  { %504 = vmatmul.mubr.f32.vlgmr.msra.gmra.mrb[2].mxu0 %v237_v21 }
 0x2dc   :  { %v326_v0 = vpop.f32.mrb[2].mxu0 }
 0x2dd   :  { %v327_v23 = vadd.f32 %v349_v22, %v326_v0  ;;  %v505_v24 = vpop.f32.mrb[3].mxu0 }
 0x2df   :  { %330 = vst [vmem:[#allocation8] sm:$0xff] %v327_v23 }
 0x2e0   :  { %664 = shalt.err (!%p661_p0)
}
 0x2e1   :  { %s665_s25 = scalar_lea.hbm %s791_s3, 128 }
 0x2e2   :  { %p666_p1 = scmp.ne.s32.totalorder %s791_s3, %s665_s25  ;;  %p669_p2 = scmp.lt.u32.totalorder %s665_s25, %s791_s3 }
 0x2e4   :  { %p671_p3 = pnand %p669_p2, %p666_p1 }
 0x2e6   :  { %674 = shalt.err (!%p671_p3)
}
 0x2e7   :  { %340 = dma.vmem_to_hbm [thread:$0]  %s338_s21, 128, %s791_s3, [#allocation4]  }
 0x2e8   :  { %679 = dma.done.wait [#allocation4], 128  }
 0x2e9   :  { %680 = vsyncadd [#allocation4], 4294967168 }
 0x2ea   :  { %344 = vsyncpa [#allocation3], 1 }
 0x2eb   :  { %345 = vsyncpa [#allocation6], 1 }
 0x2ec   :  { %346 = vsyncpa [#allocation4], 1 }

</bundles_post_ra>
